<compile_context>
chip_gen: v6e
topology: v6e:2x2x1
jax: 0.10.0
libtpu: 0.0.40
codegen_flags: <defaults>
</compile_context>

<pallas_src>
import functools

import jax
import jax.numpy as jnp
from jax import lax
from jax.experimental import pallas as pl
from jax.experimental.pallas import tpu as pltpu


# Each of the 16 difflogic gate relaxations (bin_op_s order) written as
# op_g(a, b) = c0 + c1*a + c2*b + c3*(a*b).  Columns: (1, a, b, a*b).
_GATE_COEFFS = (
    (0.0, 0.0, 0.0, 0.0),    # 0: false
    (0.0, 0.0, 0.0, 1.0),    # 1: a AND b
    (0.0, 1.0, 0.0, -1.0),   # 2: a AND NOT b
    (0.0, 1.0, 0.0, 0.0),    # 3: a
    (0.0, 0.0, 1.0, -1.0),   # 4: NOT a AND b
    (0.0, 0.0, 1.0, 0.0),    # 5: b
    (0.0, 1.0, 1.0, -2.0),   # 6: a XOR b
    (0.0, 1.0, 1.0, -1.0),   # 7: a OR b
    (1.0, -1.0, -1.0, 1.0),  # 8: NOR
    (1.0, -1.0, -1.0, 2.0),  # 9: XNOR
    (1.0, 0.0, -1.0, 0.0),   # 10: NOT b
    (1.0, 0.0, -1.0, 1.0),   # 11: a OR NOT b
    (1.0, -1.0, 0.0, 0.0),   # 12: NOT a
    (1.0, -1.0, 0.0, 1.0),   # 13: NOT a OR b
    (1.0, 0.0, 0.0, -1.0),   # 14: NAND
    (1.0, 0.0, 0.0, 0.0),    # 15: true
)


def fused_logic_kernel(x_ref, ia_ref, ib_ref, c_ref, o_ref):
    """Fused gather + affine gate mix.

    x_ref  : (TB, in_dim) io_dtype — batch tile of the layer input
    ia_ref : (1, TN) int32        — idx_a for this neuron tile
    ib_ref : (1, TN) int32        — idx_b for this neuron tile
    c_ref  : (4, TN) float32      — rows (W0, Wa, Wb, Wab)
    o_ref  : (TB, TN) io_dtype
    """
    x = x_ref[...]
    in_dim = x.shape[1]
    tile_n = o_ref.shape[1]

    # One-hot selection matrices built in-register from the index blocks.
    feat = lax.broadcasted_iota(jnp.int32, (in_dim, tile_n), 0)
    one = jnp.ones((), dtype=x.dtype)
    zero = jnp.zeros((), dtype=x.dtype)
    sel_a = jnp.where(feat == ia_ref[...], one, zero)      # (in_dim, TN)
    sel_b = jnp.where(feat == ib_ref[...], one, zero)

    # Gather-by-matmul on the (otherwise idle) MXU.  For f32 I/O use HIGHEST
    # precision so the gather is exact (one-hot * x, f32 accumulation); bf16
    # inputs are single-pass native either way.
    prec = lax.Precision.HIGHEST if x.dtype == jnp.float32 else None
    a = jnp.dot(x, sel_a, preferred_element_type=jnp.float32, precision=prec)
    b = jnp.dot(x, sel_b, preferred_element_type=jnp.float32, precision=prec)

    w0 = c_ref[0:1, :]
    wa = c_ref[1:2, :]
    wb = c_ref[2:3, :]
    wab = c_ref[3:4, :]
    # Horner form: 3 mul + 3 add per element.
    y = w0 + wb * b + a * (wa + wab * b)
    o_ref[...] = y.astype(o_ref.dtype)


def _round_down(v, m):
    return max(m, (v // m) * m)


def _choose_tiles(batch, out_dim, in_dim, itemsize):
    """Pick (tile_b, tile_n) that are layout-legal and fit a v7x-safe budget."""
    # Neuron (lane) tile: full extent (always legal) when small enough,
    # otherwise a multiple of 128 (lane-dense stores).  Cap so the in-kernel
    # one-hot matrices (2 * in_dim * tile_n) stay <= ~12 MiB.
    sel_cap = max(128, (12 << 20) // max(2 * in_dim * itemsize, 1))
    if out_dim <= min(1536, sel_cap):
        tile_n = out_dim
    else:
        tile_n = _round_down(min(1024, sel_cap), 128)

    # Batch (sublane) tile: multiple of 16 (bf16 packs [16,128] per vreg),
    # sized so the per-row working set (x row, y row, f32 a/b rows) stays
    # under ~6 MiB per buffer.
    per_row = in_dim * itemsize + tile_n * itemsize + 2 * tile_n * 4
    tile_b = (6 << 20) // max(per_row, 1)
    tile_b = max(16, min(1024, tile_b))
    tile_b = (tile_b // 16) * 16
    if tile_b >= batch:
        tile_b = batch          # full extent — always layout-legal
    return tile_b, tile_n


def logic_layer_pallas(x, idx_a, idx_b, coeffs_t):
    """x: (B, in_dim) io_dtype; idx_*: (1, out_dim) i32; coeffs_t: (4, out_dim) f32."""
    B, in_dim = x.shape
    out_dim = coeffs_t.shape[1]
    io_dtype = x.dtype
    itemsize = jnp.dtype(io_dtype).itemsize

    tile_b, tile_n = _choose_tiles(B, out_dim, in_dim, itemsize)
    # cdiv grid: partial edge blocks are padded on read and cropped on write,
    # so arbitrary B / out_dim are safe (garbage in padded lanes is discarded).
    grid = (pl.cdiv(B, tile_b), pl.cdiv(out_dim, tile_n))   # batch OUTER

    # VMEM budget: double-buffered pipelined blocks + single-buffered
    # in-kernel intermediates (one-hot matrices, f32 a/b).
    x_block = tile_b * in_dim * itemsize
    out_block = tile_b * tile_n * itemsize
    small = (2 + 4) * tile_n * 4
    sel_bytes = 2 * in_dim * tile_n * itemsize
    ab_bytes = 2 * tile_b * tile_n * 4
    vmem_estimate = 2 * (x_block + out_block + small) + sel_bytes + ab_bytes
    vmem_limit = int(min(max(2 * vmem_estimate, 24 << 20), 40 << 20))

    return pl.pallas_call(
        fused_logic_kernel,
        out_shape=jax.ShapeDtypeStruct((B, out_dim), io_dtype),
        grid_spec=pltpu.PrefetchScalarGridSpec(
            num_scalar_prefetch=0,
            grid=grid,
            in_specs=[
                # x depends only on the OUTER (batch) grid axis: its block
                # index is constant across inner neuron steps, so the
                # pipeline skips re-fetching it.
                pl.BlockSpec((tile_b, in_dim), lambda i, j: (i, 0)),
                pl.BlockSpec((1, tile_n), lambda i, j: (0, j)),
                pl.BlockSpec((1, tile_n), lambda i, j: (0, j)),
                pl.BlockSpec((4, tile_n), lambda i, j: (0, j)),
            ],
            out_specs=pl.BlockSpec((tile_b, tile_n), lambda i, j: (i, j)),
        ),
        compiler_params=pltpu.CompilerParams(
            dimension_semantics=("parallel", "parallel"),
            vmem_limit_bytes=vmem_limit,
        ),
    )(x, idx_a, idx_b, coeffs_t)


def logic_layer_forward(x, weights, idx_a, idx_b, temp=1.0, training=True,
                        io_dtype=jnp.bfloat16):
    """LogicLayer.forward (python path, 'random' connections), Pallas hot path.

    io_dtype=bfloat16 halves HBM traffic (recommended); io_dtype=float32
    keeps near-bit parity with the reference.  grad_factor only affects the
    backward pass, so the forward is unchanged by it.
    """
    out_dim = weights.shape[0]
    if training:
        w = jax.nn.softmax(weights.astype(jnp.float32) / temp, axis=-1)
    else:  # eval: hard one-hot gate selection
        w = jax.nn.one_hot(jnp.argmax(weights, axis=-1), 16, dtype=jnp.float32)
    gate_coeffs = jnp.asarray(_GATE_COEFFS, dtype=jnp.float32)      # (16, 4)
    coeffs_t = jnp.transpose(w @ gate_coeffs)                       # (4, out_dim) f32
    ia = idx_a.astype(jnp.int32).reshape(1, out_dim)
    ib = idx_b.astype(jnp.int32).reshape(1, out_dim)
    return logic_layer_pallas(x.astype(io_dtype), ia, ib, coeffs_t)


def logic_layer_reference(x, weights, idx_a, idx_b, temp=1.0):
    """Pure-JAX reference mirroring difflogic's bin_op_s (training mode)."""
    a = x[:, idx_a]
    b = x[:, idx_b]
    w = jax.nn.softmax(weights / temp, axis=-1)            # (out_dim, 16)
    ab = a * b
    one = jnp.ones_like(a)
    ops = jnp.stack(
        [
            jnp.zeros_like(a), ab, a - ab, a, b - ab, b,
            a + b - 2 * ab, a + b - ab, one - (a + b - ab),
            one - (a + b - 2 * ab), one - b, one - b + ab,
            one - a, one - a + ab, one - ab, one,
        ],
        axis=-1,
    )                                                      # (B, out_dim, 16)
    return jnp.sum(ops * w[None, :, :], axis=-1)


if __name__ == "__main__":
    # Small shapes consistent with the module: x is (batch, in_dim).
    batch, in_dim, out_dim, temp = 8, 32, 256, 1.0

    key = jax.random.PRNGKey(0)
    k_x, k_w, k_a, k_b = jax.random.split(key, 4)

    x = jax.random.normal(k_x, (batch, in_dim), dtype=jnp.float32)
    weights = jax.random.normal(k_w, (out_dim, 16), dtype=jnp.float32)
    # Random connections (equivalent in spirit to get_connections('random')).
    idx_a = jax.random.randint(k_a, (out_dim,), 0, in_dim, dtype=jnp.int32)
    idx_b = jax.random.randint(k_b, (out_dim,), 0, in_dim, dtype=jnp.int32)
    # TODO(synk): weights_connections / mask are built in __init__ but unused
    # by the 'random'-connections forward path, so they are omitted here.

    y_ref = logic_layer_reference(x, weights, idx_a, idx_b, temp=temp)

    # f32 I/O: near-bit parity with the reference (exact-precision gather).
    fwd_f32 = jax.jit(functools.partial(
        logic_layer_forward, temp=temp, io_dtype=jnp.float32))
    y32 = fwd_f32(x, weights, idx_a, idx_b)
    jax.block_until_ready(y32)
    assert y32.shape == (batch, out_dim), y32.shape
    assert jnp.allclose(y32, y_ref, atol=1e-5, rtol=1e-5), float(
        jnp.max(jnp.abs(y32 - y_ref)))

    # bf16 I/O (perf default): half the HBM bytes, relaxed tolerance.
    fwd_bf16 = jax.jit(functools.partial(
        logic_layer_forward, temp=temp, io_dtype=jnp.bfloat16))
    y16 = fwd_bf16(x, weights, idx_a, idx_b).astype(jnp.float32)
    jax.block_until_ready(y16)
    assert y16.shape == (batch, out_dim), y16.shape
    assert jnp.allclose(y16, y_ref, atol=5e-2, rtol=5e-2), float(
        jnp.max(jnp.abs(y16 - y_ref)))

    print("KERNEL_OK")
</pallas_src>

<mosaic_0001>
module attributes {stable_mosaic.version = 11 : i64} {
  func.func @fused_logic_kernel(%arg0: i32, %arg1: i32, %arg2: memref<8x32xf32, #tpu.memory_space<vmem>>, %arg3: memref<1x256xi32, #tpu.memory_space<vmem>>, %arg4: memref<1x256xi32, #tpu.memory_space<vmem>>, %arg5: memref<4x256xf32, #tpu.memory_space<vmem>>, %arg6: memref<8x256xf32, #tpu.memory_space<vmem>>) attributes {dimension_semantics = [#tpu.dimension_semantics<parallel>, #tpu.dimension_semantics<parallel>], iteration_bounds = array<i64: 1, 1>, scalar_prefetch = 0 : i64, scratch_operands = 0 : i64, tpu.core_type = #tpu.core_type<tc>, window_params = [{transform_indices = @transform_0, window_bounds = array<i64: 8, 32>}, {transform_indices = @transform_1, window_bounds = array<i64: 1, 256>}, {transform_indices = @transform_2, window_bounds = array<i64: 1, 256>}, {transform_indices = @transform_3, window_bounds = array<i64: 4, 256>}, {transform_indices = @transform_4, window_bounds = array<i64: 8, 256>}]} {
    %c0 = arith.constant 0 : index
    %c0_0 = arith.constant 0 : index
    %0 = vector.load %arg2[%c0, %c0_0] : memref<8x32xf32, #tpu.memory_space<vmem>>, vector<8x32xf32>
    %1 = tpu.iota {dimensions = array<i32: 0>} : vector<32x256xi32>
    %c0_1 = arith.constant 0 : index
    %c0_2 = arith.constant 0 : index
    %2 = vector.load %arg3[%c0_1, %c0_2] : memref<1x256xi32, #tpu.memory_space<vmem>>, vector<1x256xi32>
    %3 = vector.broadcast %2 : vector<1x256xi32> to vector<32x256xi32>
    %4 = arith.cmpi eq, %1, %3 : vector<32x256xi32>
    %cst = arith.constant 1.000000e+00 : f32
    %cst_3 = arith.constant 0.000000e+00 : f32
    %5 = vector.broadcast %cst : f32 to vector<32x256xf32>
    %6 = vector.broadcast %cst_3 : f32 to vector<32x256xf32>
    %7 = arith.select %4, %5, %6 : vector<32x256xi1>, vector<32x256xf32>
    %c0_4 = arith.constant 0 : index
    %c0_5 = arith.constant 0 : index
    %8 = vector.load %arg4[%c0_4, %c0_5] : memref<1x256xi32, #tpu.memory_space<vmem>>, vector<1x256xi32>
    %9 = vector.broadcast %8 : vector<1x256xi32> to vector<32x256xi32>
    %10 = arith.cmpi eq, %1, %9 : vector<32x256xi32>
    %cst_6 = arith.constant 1.000000e+00 : f32
    %cst_7 = arith.constant 0.000000e+00 : f32
    %11 = vector.broadcast %cst_6 : f32 to vector<32x256xf32>
    %12 = vector.broadcast %cst_7 : f32 to vector<32x256xf32>
    %13 = arith.select %10, %11, %12 : vector<32x256xi1>, vector<32x256xf32>
    %cst_8 = arith.constant dense<0.000000e+00> : vector<8x256xf32>
    %14 = tpu.matmul %0, %7, %cst_8 {dimension_numbers = #tpu.dot_dimension_numbers<[1], [0], [0], [1], [0, 0, 1, 1], [], []>, precision = #tpu.contract_precision<fp32>} : vector<8x32xf32>, vector<32x256xf32>, vector<8x256xf32> -> vector<8x256xf32>
    %cst_9 = arith.constant dense<0.000000e+00> : vector<8x256xf32>
    %15 = tpu.matmul %0, %13, %cst_9 {dimension_numbers = #tpu.dot_dimension_numbers<[1], [0], [0], [1], [0, 0, 1, 1], [], []>, precision = #tpu.contract_precision<fp32>} : vector<8x32xf32>, vector<32x256xf32>, vector<8x256xf32> -> vector<8x256xf32>
    %c0_10 = arith.constant 0 : index
    %c0_11 = arith.constant 0 : index
    %16 = vector.load %arg5[%c0_10, %c0_11] : memref<4x256xf32, #tpu.memory_space<vmem>>, vector<1x256xf32>
    %c1 = arith.constant 1 : index
    %c0_12 = arith.constant 0 : index
    %17 = vector.load %arg5[%c1, %c0_12] : memref<4x256xf32, #tpu.memory_space<vmem>>, vector<1x256xf32>
    %c2 = arith.constant 2 : index
    %c0_13 = arith.constant 0 : index
    %18 = vector.load %arg5[%c2, %c0_13] : memref<4x256xf32, #tpu.memory_space<vmem>>, vector<1x256xf32>
    %c3 = arith.constant 3 : index
    %c0_14 = arith.constant 0 : index
    %19 = vector.load %arg5[%c3, %c0_14] : memref<4x256xf32, #tpu.memory_space<vmem>>, vector<1x256xf32>
    %20 = vector.broadcast %18 : vector<1x256xf32> to vector<8x256xf32>
    %21 = arith.mulf %20, %15 : vector<8x256xf32>
    %22 = vector.broadcast %16 : vector<1x256xf32> to vector<8x256xf32>
    %23 = arith.addf %22, %21 : vector<8x256xf32>
    %24 = vector.broadcast %19 : vector<1x256xf32> to vector<8x256xf32>
    %25 = arith.mulf %24, %15 : vector<8x256xf32>
    %26 = vector.broadcast %17 : vector<1x256xf32> to vector<8x256xf32>
    %27 = arith.addf %26, %25 : vector<8x256xf32>
    %28 = arith.mulf %14, %27 : vector<8x256xf32>
    %29 = arith.addf %23, %28 : vector<8x256xf32>
    %c0_15 = arith.constant 0 : index
    %c0_16 = arith.constant 0 : index
    %30 = vector.load %arg6[%c0_15, %c0_16] : memref<8x256xf32, #tpu.memory_space<vmem>>, vector<8x256xf32>
    tpu.vector_store %arg6[%c0_15, %c0_16], %29 {strides = array<i32>} : memref<8x256xf32, #tpu.memory_space<vmem>>, vector<8x256xf32>,
    return
  }
  func.func @transform_0(%arg0: i32, %arg1: i32) -> (i32, i32) {
    %c0_i32 = arith.constant 0 : i32
    %c0_i32_0 = arith.constant 0 : i32
    return %arg0, %c0_i32 : i32, i32
  }
  func.func @transform_1(%arg0: i32, %arg1: i32) -> (i32, i32) {
    %c0_i32 = arith.constant 0 : i32
    %c0_i32_0 = arith.constant 0 : i32
    return %c0_i32, %arg1 : i32, i32
  }
  func.func @transform_2(%arg0: i32, %arg1: i32) -> (i32, i32) {
    %c0_i32 = arith.constant 0 : i32
    %c0_i32_0 = arith.constant 0 : i32
    return %c0_i32, %arg1 : i32, i32
  }
  func.func @transform_3(%arg0: i32, %arg1: i32) -> (i32, i32) {
    %c0_i32 = arith.constant 0 : i32
    %c0_i32_0 = arith.constant 0 : i32
    return %c0_i32, %arg1 : i32, i32
  }
  func.func @transform_4(%arg0: i32, %arg1: i32) -> (i32, i32) {
    %c0_i32 = arith.constant 0 : i32
    return %arg0, %arg1 : i32, i32
  }
}

</mosaic_0001>

<bundles_post_ra>
// kernel: logic_layer_forward.1
= control target key start
LH: loop header
LB: loop body
LE: loop exit
PB: predicated region body
PF: predicated region fallthrough
CT: control target
= control target key end

     0   :  { %v19_v0 = vlaneseq  ;;  %vm74_vm0 = vcmask 261120   ;;  %v1223_v2 = vmov 0.0   ;;  %s1759_s0 = inlined_call_operand.vmem [shape: f32[8,32], index: 0, kind: input, shape index: {}]   ;;  %s1760_s1 = inlined_call_operand.vmem [shape: s32[1,256], index: 1, kind: input, shape index: {}]   ;;  %s1761_s2 = inlined_call_operand.vmem [shape: s32[1,256], index: 2, kind: input, shape index: {}]   ;;  %s1762_s3 = inlined_call_operand.vmem [shape: f32[4,256], index: 3, kind: input, shape index: {}]   ;;  %s1763_s4 = inlined_call_operand.hbm [shape: f32[8,256], index: 4, kind: output, shape index: {}]  }
   0x1   :  { %v18_v1 = vld [vmem:[%s1759_s0] sm:$0xff]  ;;  %142 = vmatprep.mubr.f32.mxu0 %v1223_v2  ;;  %250 = vmatprep.mubr.f32.mxu1 %v1223_v2 }
   0x2   :  { %v76_v3 = vsel %vm74_vm0, %v18_v1, 0 }
   0x3   :  { %9 = vsyncpa [#allocation3], 0  ;;  %v1256_v4 = vshrl.u32 %v19_v0, 7  ;;  %v1258_v5 = vand.u32 4294901760, %v76_v3  ;;  %v24_v6 = vld [vmem:[%s1760_s1] sm:$0x3] }
   0x4   :  { %v1224_v16 = vmov 1.0   ;;  %v49_v48 = vld [vmem:[%s1761_s2] sm:$0x3] }
   0x5   :  { %v1264_v7 = vadd.s32 24, %v1256_v4  ;;  %v1267_v8 = vsub.s32 1, %v1256_v4  ;;  %v1270_v9 = vsub.s32 0, %v1256_v4  ;;  %v1273_v10 = vadd.s32 16, %v1256_v4 }
   0x6   :  { %v1276_v11 = vadd.s32 8, %v1256_v4  ;;  %v1279_v12 = vsub.f32 %v76_v3, %v1258_v5 }
   0x7   :  { %v1282_v13 = vrot.slane %v24_v6, %v1267_v8  ;;  %v1285_v14 = vrot.slane %v24_v6, %v1270_v9  ;;  %v1422_v57 = vrot.slane %v49_v48, %v1267_v8  ;;  %v1426_v59 = vrot.slane %v49_v48, %v1270_v9 }
   0x8   :  { %v1288_v15 = vand.u32 4294901760, %v1279_v12 }
   0x9   :  { %vm40_vm1 = vcmp.eq.s32.totalorder %v1264_v7, %v1282_v13  ;;  %vm39_vm2 = vcmp.eq.s32.totalorder %v1264_v7, %v1285_v14  ;;  %vm38_vm3 = vcmp.eq.s32.totalorder %v1273_v10, %v1282_v13  ;;  %vm37_vm4 = vcmp.eq.s32.totalorder %v1273_v10, %v1285_v14 }
   0xa   :  { %1147 = vmatprep.subr.msk.mxu0 %vm40_vm1, %v1224_v16  ;;  %v46_v17 = vsel %vm38_vm3, 1.0, %v1223_v2  ;;  %v45_v18 = vsel %vm37_vm4, 1.0, %v1223_v2  ;;  %vm36_vm5 = vcmp.eq.s32.totalorder %v1276_v11, %v1282_v13  ;;  %vm35_vm6 = vcmp.eq.s32.totalorder %v1276_v11, %v1285_v14 }
   0xb   :  { %1148 = vmatpush1.msk.msra.mxu0 %vm39_vm2, %v1224_v16  ;;  %v1318_v19 = vsub.f32 %v46_v17, %v46_v17  ;;  %v1320_v20 = vsub.f32 %v45_v18, %v45_v18  ;;  %v44_v21 = vsel %vm36_vm5, 1.0, %v1223_v2  ;;  %v43_v22 = vsel %vm35_vm6, 1.0, %v1223_v2 }
   0xc   :  { %1149 = vmatprep.subr.msk.mxu0 %vm38_vm3, %v1224_v16  ;;  %v1334_v23 = vsub.f32 %v44_v21, %v44_v21  ;;  %v1336_v24 = vsub.f32 %v43_v22, %v43_v22  ;;  %vm34_vm7 = vcmp.eq.s32.totalorder %v1256_v4, %v1282_v13  ;;  %v48_v25 = vsel %vm40_vm1, 1.0, %v1223_v2 }
   0xd   :  { %1150 = vmatpush1.msk.msra.mxu0 %vm37_vm4, %v1224_v16  ;;  %v42_v26 = vsel %vm34_vm7, 1.0, %v1223_v2  ;;  %v178_v27 = vsub.f32 %v48_v25, %v48_v25  ;;  %vm33_vm8 = vcmp.eq.s32.totalorder %v1256_v4, %v1285_v14  ;;  %v47_v28 = vsel %vm39_vm2, 1.0, %v1223_v2 }
   0xe   :  { %1151 = vmatprep.subr.msk.mxu0 %vm36_vm5, %v1224_v16  ;;  %v1362_v29 = vsub.f32 %v42_v26, %v42_v26  ;;  %v41_v30 = vsel %vm33_vm8, 1.0, %v1223_v2  ;;  %v1368_v31 = vsub.f32 %v47_v28, %v47_v28  ;;  %v189_v32 = vand.u32 4294901760, %v1318_v19 }
   0xf   :  { %1152 = vmatpush1.msk.msra.mxu0 %vm35_vm6, %v1224_v16  ;;  %v179_v33 = vand.u32 4294901760, %v178_v27  ;;  %v1375_v34 = vsub.f32 %v41_v30, %v41_v30  ;;  %v146_v35 = vsub.f32 %v1279_v12, %v1288_v15  ;;  %v194_v36 = vand.u32 4294901760, %v1320_v20 }
  0x10   :  { %1153 = vmatprep.subr.msk.mxu0 %vm34_vm7, %v1224_v16  ;;  %v184_v37 = vand.u32 4294901760, %v1368_v31  ;;  %v190_v38 = vsub.f32 %v1318_v19, %v189_v32  ;;  %v199_v39 = vand.u32 4294901760, %v1334_v23  ;;  %v204_v40 = vand.u32 4294901760, %v1336_v24 }
  0x11   :  { %v180_v41 = vsub.f32 %v178_v27, %v179_v33  ;;  %1154 = vmatpush1.msk.msra.mxu0 %vm33_vm8, %v1224_v16  ;;  %v1394_v42 = vand.u32 4294901760, %v146_v35  ;;  %v195_v43 = vsub.f32 %v1320_v20, %v194_v36  ;;  %v209_v44 = vand.u32 4294901760, %v1362_v29 }
  0x12   :  { %v185_v45 = vsub.f32 %v1368_v31, %v184_v37  ;;  %283 = vmatprep.subr.mxu0 %v178_v27  ;;  %v200_v46 = vsub.f32 %v1334_v23, %v199_v39  ;;  %v205_v47 = vsub.f32 %v1336_v24, %v204_v40  ;;  %v191_v50 = vand.u32 4294901760, %v190_v38 }
  0x13   :  { %v181_v49 = vand.u32 4294901760, %v180_v41  ;;  %148 = vmatmul.mubr.f32.vlgmr.msra.gmra.mxu0 %v1394_v42  ;;  %v210_v51 = vsub.f32 %v1362_v29, %v209_v44  ;;  %v214_v52 = vand.u32 4294901760, %v1375_v34  ;;  %v196_v54 = vand.u32 4294901760, %v195_v43 }
  0x14   :  { %v186_v53 = vand.u32 4294901760, %v185_v45  ;;  %285 = vmatpush1.msra.mxu0 %v1368_v31  ;;  %330 = vmatprep.mubr.f32.mxu0 %v1223_v2  ;;  %v201_v55 = vand.u32 4294901760, %v200_v46  ;;  %v206_v58 = vand.u32 4294901760, %v205_v47  ;;  %vm65_vm9 = vcmp.eq.s32.totalorder %v1264_v7, %v1422_v57 }
  0x15   :  { %182 = vmatprep.subr.mxu1 %v181_v49  ;;  %287 = vmatprep.subr.mxu0 %v1318_v19  ;;  %v215_v56 = vsub.f32 %v1375_v34, %v214_v52  ;;  %v211_v60 = vand.u32 4294901760, %v210_v51  ;;  %vm64_vm10 = vcmp.eq.s32.totalorder %v1264_v7, %v1426_v59  ;;  %vm63_vm11 = vcmp.eq.s32.totalorder %v1273_v10, %v1422_v57 }
  0x16   :  { %187 = vmatpush1.msra.mxu1 %v186_v53  ;;  %289 = vmatpush1.msra.mxu0 %v1320_v20  ;;  %v73_v62 = vsel %vm65_vm9, 1.0, %v1223_v2  ;;  %v72_v63 = vsel %vm64_vm10, 1.0, %v1223_v2  ;;  %vm62_vm12 = vcmp.eq.s32.totalorder %v1273_v10, %v1426_v59  ;;  %v71_v0 = vsel %vm63_vm11, 1.0, %v1223_v2 }
  0x17   :  { %192 = vmatprep.subr.mxu1 %v191_v50  ;;  %291 = vmatprep.subr.mxu0 %v1334_v23  ;;  %v216_v61 = vand.u32 4294901760, %v215_v56  ;;  %vm61_vm13 = vcmp.eq.s32.totalorder %v1276_v11, %v1422_v57  ;;  %v1470_v1 = vsub.f32 %v73_v62, %v73_v62  ;;  %vm60_vm14 = vcmp.eq.s32.totalorder %v1276_v11, %v1426_v59 }
  0x18   :  { %197 = vmatpush1.msra.mxu1 %v196_v54  ;;  %293 = vmatpush1.msra.mxu0 %v1336_v24  ;;  %v1480_v3 = vsub.f32 %v72_v63, %v72_v63  ;;  %v70_v6 = vsel %vm62_vm12, 1.0, %v1223_v2  ;;  %vm59_vm15 = vcmp.eq.s32.totalorder %v1256_v4, %v1422_v57  ;;  %v1494_v17 = vsub.f32 %v71_v0, %v71_v0 }
  0x19   :  { %202 = vmatprep.subr.mxu1 %v201_v55  ;;  %295 = vmatprep.subr.mxu0 %v1362_v29  ;;  %v69_v18 = vsel %vm61_vm13, 1.0, %v1223_v2  ;;  %vm58_vm0 = vcmp.eq.s32.totalorder %v1256_v4, %v1426_v59  ;;  %v68_v19 = vsel %vm60_vm14, 1.0, %v1223_v2  ;;  %v1517_v20 = vsub.f32 %v70_v6, %v70_v6 }
  0x1a   :  { %207 = vmatpush1.msra.mxu1 %v206_v58  ;;  %297 = vmatpush1.msra.mxu0 %v1375_v34  ;;  %v67_v21 = vsel %vm59_vm15, 1.0, %v1223_v2  ;;  %v674_v22 = vand.u32 4294901760, %v1470_v1  ;;  %v1530_v23 = vsub.f32 %v69_v18, %v69_v18  ;;  %v66_v24 = vsel %vm58_vm0, 1.0, %v1223_v2  ;;  %v1197_v18 = vld [vmem:[%s1762_s3 + $0x3] ss:$4 sm:$0x3] }
  0x1b   :  { %212 = vmatprep.subr.mxu1 %v211_v60  ;;  %333 = vmatmul.mubr.f32.vlgmr.msra.gmra.mxu0 %v1279_v12  ;;  %v679_v25 = vand.u32 4294901760, %v1480_v3  ;;  %v1542_v26 = vsub.f32 %v68_v19, %v68_v19  ;;  %v684_v27 = vand.u32 4294901760, %v1494_v17  ;;  %v1548_v28 = vsub.f32 %v67_v21, %v67_v21  ;;  %v1195_v21 = vld [vmem:[%s1762_s3 + $0x1] ss:$4 sm:$0x3] }
  0x1c   :  { %217 = vmatpush1.msra.mxu1 %v216_v61  ;;  %439 = vmatprep.subr.mxu0 %v179_v33  ;;  %v675_v29 = vsub.f32 %v1470_v1, %v674_v22  ;;  %v1558_v30 = vsub.f32 %v66_v24, %v66_v24  ;;  %v689_v31 = vand.u32 4294901760, %v1517_v20  ;;  %v694_v33 = vand.u32 4294901760, %v1530_v23 }
  0x1d   :  { %252 = vmatmul.mubr.f32.vlgmr.msra.gmra.mxu1 %v1258_v5  ;;  %1155 = vmatprep.subr.msk.mxu1 %vm40_vm1, %v1224_v16  ;;  %v685_v34 = vsub.f32 %v1494_v17, %v684_v27  ;;  %v699_v35 = vand.u32 4294901760, %v1542_v26 }
  0x1e   :  { %1156 = vmatpush1.msk.msra.mxu1 %vm39_vm2, %v1224_v16  ;;  %442 = vmatpush1.msra.mxu0 %v184_v37  ;;  %v676_v37 = vand.u32 4294901760, %v675_v29  ;;  %v690_v38 = vsub.f32 %v1517_v20, %v689_v31  ;;  %v695_v41 = vsub.f32 %v1530_v23, %v694_v33 }
  0x1f   :  { %1157 = vmatprep.subr.msk.mxu1 %vm38_vm3, %v1224_v16  ;;  %445 = vmatprep.subr.mxu0 %v189_v32  ;;  %v680_v32 = vsub.f32 %v1480_v3, %v679_v25  ;;  %v686_v43 = vand.u32 4294901760, %v685_v34  ;;  %v700_v13 = vsub.f32 %v1542_v26, %v699_v35 }
  0x20   :  { %1158 = vmatpush1.msk.msra.mxu1 %vm37_vm4, %v1224_v16  ;;  %448 = vmatpush1.msra.mxu0 %v194_v36  ;;  %v704_v36 = vand.u32 4294901760, %v1548_v28  ;;  %v691_v14 = vand.u32 4294901760, %v690_v38  ;;  %v696_v46 = vand.u32 4294901760, %v695_v41  ;;  %v1122_v38 = vrot.slane %v1195_v21, %v1267_v8 }
  0x21   :  { %1159 = vmatprep.subr.msk.mxu1 %vm36_vm5, %v1224_v16  ;;  %451 = vmatprep.subr.mxu0 %v199_v39  ;;  %v709_v39 = vand.u32 4294901760, %v1558_v30  ;;  %v701_v47 = vand.u32 4294901760, %v700_v13 }
  0x22   :  { %1160 = vmatpush1.msk.msra.mxu1 %vm35_vm6, %v1224_v16  ;;  %403 = vmatprep.mubr.f32.mxu1 %v1223_v2 }
  0x23   :  { %1161 = vmatprep.subr.msk.mxu1 %vm34_vm7, %v1224_v16  ;;  %454 = vmatpush1.msra.mxu0 %v204_v40  ;;  %v681_v40 = vand.u32 4294901760, %v680_v32  ;;  %v710_v45 = vsub.f32 %v1558_v30, %v709_v39 }
  0x24   :  { %1162 = vmatpush1.msk.msra.mxu1 %vm33_vm8, %v1224_v16  ;;  %457 = vmatprep.subr.mxu0 %v209_v44  ;;  %v705_v44 = vsub.f32 %v1548_v28, %v704_v36 }
  0x25   :  { %407 = vmatmul.mubr.f32.vlgmr.msra.gmra.mxu1 %v1288_v15  ;;  %1163 = vmatprep.subr.msk.mxu1 %vm40_vm1, %v1224_v16  ;;  %v711_v49 = vand.u32 4294901760, %v710_v45 }
  0x26   :  { %460 = vmatpush1.msra.mxu0 %v214_v52  ;;  %493 = vmatprep.mubr.f32.mxu0 %v1223_v2  ;;  %v706_v48 = vand.u32 4294901760, %v705_v44 }
  0x27   :  { %1164 = vmatpush1.msk.msra.mxu1 %vm39_vm2, %v1224_v16  ;;  %495 = vmatmul.mubr.f32.vlgmr.msra.gmra.mxu0 %v1258_v5 }
  0x28   :  { %1165 = vmatprep.subr.msk.mxu1 %vm38_vm3, %v1224_v16  ;;  %1171 = vmatprep.subr.msk.mxu0 %vm65_vm9, %v1224_v16 }
  0x29   :  { %1166 = vmatpush1.msk.msra.mxu1 %vm37_vm4, %v1224_v16  ;;  %1172 = vmatpush1.msk.msra.mxu0 %vm64_vm10, %v1224_v16 }
  0x2a   :  { %1167 = vmatprep.subr.msk.mxu1 %vm36_vm5, %v1224_v16  ;;  %1173 = vmatprep.subr.msk.mxu0 %vm63_vm11, %v1224_v16 }
  0x2b   :  { %1168 = vmatpush1.msk.msra.mxu1 %vm35_vm6, %v1224_v16  ;;  %1174 = vmatpush1.msk.msra.mxu0 %vm62_vm12, %v1224_v16 }
  0x2c   :  { %1169 = vmatprep.subr.msk.mxu1 %vm34_vm7, %v1224_v16  ;;  %1175 = vmatprep.subr.msk.mxu0 %vm61_vm13, %v1224_v16 }
  0x2d   :  { %1170 = vmatpush1.msk.msra.mxu1 %vm33_vm8, %v1224_v16  ;;  %565 = vmatprep.mubr.f32.mxu1 %v1223_v2 }
  0x2e   :  { %1176 = vmatpush1.msk.msra.mxu0 %vm60_vm14, %v1224_v16  ;;  %567 = vmatmul.mubr.f32.vlgmr.msra.gmra.mxu1 %v1258_v5 }
  0x2f   :  { %1177 = vmatprep.subr.msk.mxu0 %vm59_vm15, %v1224_v16  ;;  %677 = vmatprep.subr.mxu1 %v676_v37 }
  0x30   :  { %1178 = vmatpush1.msk.msra.mxu0 %vm58_vm0, %v1224_v16  ;;  %682 = vmatpush1.msra.mxu1 %v681_v40 }
  0x31   :  { %637 = vmatprep.mubr.f32.mxu0 %v1223_v2  ;;  %687 = vmatprep.subr.mxu1 %v686_v43 }
  0x32   :  { %778 = vmatprep.subr.mxu0 %v1470_v1  ;;  %643 = vmatmul.mubr.f32.vlgmr.msra.gmra.mxu0 %v1394_v42 }
  0x33   :  { %692 = vmatpush1.msra.mxu1 %v691_v14  ;;  %780 = vmatpush1.msra.mxu0 %v1480_v3 }
  0x34   :  { %697 = vmatprep.subr.mxu1 %v696_v46  ;;  %782 = vmatprep.subr.mxu0 %v1494_v17  ;;  %v1196_v17 = vld [vmem:[%s1762_s3 + $0x2] ss:$4 sm:$0x3] }
  0x35   :  { %702 = vmatpush1.msra.mxu1 %v701_v47  ;;  %784 = vmatpush1.msra.mxu0 %v1517_v20  ;;  %v1083_v34 = vrot.slane %v1196_v17, %v1267_v8 }
  0x36   :  { %707 = vmatprep.subr.mxu1 %v706_v48  ;;  %786 = vmatprep.subr.mxu0 %v1530_v23 }
  0x37   :  { %712 = vmatpush1.msra.mxu1 %v711_v49  ;;  %745 = vmatprep.mubr.f32.mxu1 %v1223_v2 }
  0x38   :  { %788 = vmatpush1.msra.mxu0 %v1542_v26  ;;  %747 = vmatmul.mubr.f32.vlgmr.msra.gmra.mxu1 %v1258_v5  ;;  %v1068_v26 = vld [vmem:[%s1762_s3] ss:$4 sm:$0x3]  ;;  %s1225_s3 = smov [#allocation2]  }
  0x39   :  { %790 = vmatprep.subr.mxu0 %v1548_v28  ;;  %1179 = vmatprep.subr.msk.mxu1 %vm65_vm9, %v1224_v16  ;;  %v1105_v28 = vrot.slane %v1197_v18, %v1270_v9  ;;  %v1096_v44 = vrot.slane %v1068_v26, %v1267_v8  ;;  %s1139_s26 = sshll.u32 %s1225_s3, 4  ;;  %s1140_s26 = int_to_ptr.vmem [resolvable:$true] %s1139_s26 }
  0x3a   :  { %792 = vmatpush1.msra.mxu0 %v1558_v30  ;;  %825 = vmatprep.mubr.f32.mxu0 %v1223_v2  ;;  %s1201_s27 = scalar_lea.vmem %s1140_s26, 256  ;;  %p1206_p1 = scmp.lt.s32.totalorder %s1140_s26, %s1140_s26 }
  0x3b   :  { %1180 = vmatpush1.msk.msra.mxu1 %vm64_vm10, %v1224_v16  ;;  %828 = vmatmul.mubr.f32.vlgmr.msra.gmra.mxu0 %v1279_v12  ;;  %p1202_p0 = scmp.ne.s32.totalorder %s1140_s26, %s1201_s27  ;;  %p1207_p2 = scmp.lt.s32.totalorder %s1201_s27, %s1201_s27 }
  0x3c   :  { %1181 = vmatprep.subr.msk.mxu1 %vm63_vm11, %v1224_v16  ;;  %934 = vmatprep.subr.mxu0 %v674_v22 }
  0x3d   :  { %1182 = vmatpush1.msk.msra.mxu1 %vm62_vm12, %v1224_v16  ;;  %937 = vmatpush1.msra.mxu0 %v679_v25  ;;  %p1208_p3 = por %p1207_p2, %p1206_p1 }
  0x3e   :  { %1183 = vmatprep.subr.msk.mxu1 %vm61_vm13, %v1224_v16  ;;  %940 = vmatprep.subr.mxu0 %v684_v27  ;;  %v1079_v27 = vrot.slane %v1196_v17, %v1270_v9 }
  0x3f   :  { %1184 = vmatpush1.msk.msra.mxu1 %vm60_vm14, %v1224_v16  ;;  %943 = vmatpush1.msra.mxu0 %v689_v31  ;;  %v1118_v31 = vrot.slane %v1195_v21, %v1270_v9  ;;  %p1209_p4 = pnand %p1208_p3, %p1202_p0 }
  0x40   :  { %1185 = vmatprep.subr.msk.mxu1 %vm59_vm15, %v1224_v16  ;;  %946 = vmatprep.subr.mxu0 %v694_v33 }
  0x41   :  { %1186 = vmatpush1.msk.msra.mxu1 %vm58_vm0, %v1224_v16  ;;  %898 = vmatprep.mubr.f32.mxu1 %v1223_v2 }
  0x42   :  { %949 = vmatpush1.msra.mxu0 %v699_v35  ;;  %902 = vmatmul.mubr.f32.vlgmr.msra.gmra.mxu1 %v1288_v15  ;;  %v1109_v35 = vrot.slane %v1197_v18, %v1267_v8 }
  0x43   :  { %952 = vmatprep.subr.mxu0 %v704_v36  ;;  %1187 = vmatprep.subr.msk.mxu1 %vm65_vm9, %v1224_v16  ;;  %v1092_v36 = vrot.slane %v1068_v26, %v1270_v9 }
  0x44   :  { %955 = vmatpush1.msra.mxu0 %v709_v39  ;;  %988 = vmatprep.mubr.f32.mxu0 %v1223_v2 }
  0x45   :  { %1188 = vmatpush1.msk.msra.mxu1 %vm64_vm10, %v1224_v16  ;;  %990 = vmatmul.mubr.f32.vlgmr.msra.gmra.mxu0 %v1258_v5 }
  0x46   :  { %1189 = vmatprep.subr.msk.mxu1 %vm63_vm11, %v1224_v16  ;;  %1060 = vmatprep.mubr.f32.mxu1 %v1223_v2 }
  0x47   :  { %1190 = vmatpush1.msk.msra.mxu1 %vm62_vm12, %v1224_v16 }
  0x48   :  { %1191 = vmatprep.subr.msk.mxu1 %vm61_vm13, %v1224_v16 }
  0x49   :  { %1192 = vmatpush1.msk.msra.mxu1 %vm60_vm14, %v1224_v16 }
  0x4a   :  { %1193 = vmatprep.subr.msk.mxu1 %vm59_vm15, %v1224_v16 }
  0x4b   :  { %1194 = vmatpush1.msk.msra.mxu1 %vm58_vm0, %v1224_v16 }
  0x4c   :  { %1062 = vmatmul.mubr.f32.vlgmr.msra.gmra.mxu1 %v1258_v5 }
  0xd3   :  { %v149_v2 = vpop.f32.mrf.mxu0 }
  0xd5   :  { %v151_v7 = vpop.f32.mrf.mxu0 }
  0xdb   :  { %v334_v12 = vpop.f32.mrf.mxu0 }
  0xdd   :  { %v253_v10 = vpop.f32.mrf.mxu1  ;;  %v336_v42 = vpop.f32.mrf.mxu0 }
  0xde   :  { %v254_v61 = vadd.f32 %v253_v10, %v149_v2 }
  0xdf   :  { %v255_v15 = vpop.f32.mrf.mxu1 }
  0xe0   :  { %v256_v63 = vadd.f32 %v255_v15, %v151_v7  ;;  %v335_v19 = vadd.f32 %v334_v12, %v254_v61 }
  0xe2   :  { %v337_v22 = vadd.f32 %v336_v42, %v256_v63 }
  0xe5   :  { %v408_v11 = vpop.f32.mrf.mxu1 }
  0xe6   :  { %v409_v24 = vadd.f32 %v408_v11, %v335_v19 }
  0xe7   :  { %v496_v50 = vpop.f32.mrf.mxu0  ;;  %v410_v51 = vpop.f32.mrf.mxu1 }
  0xe8   :  { %v411_v29 = vadd.f32 %v410_v51, %v337_v22  ;;  %v497_v39 = vadd.f32 %v496_v50, %v409_v24 }
  0xe9   :  { %v498_v52 = vpop.f32.mrf.mxu0 }
  0xea   :  { %v499_v13 = vadd.f32 %v498_v52, %v411_v29 }
  0xee   :  { %v568_v53 = vpop.f32.mrf.mxu1 }
  0xef   :  { %v569_v14 = vadd.f32 %v568_v53, %v497_v39 }
  0xf0   :  { %v570_v55 = vpop.f32.mrf.mxu1 }
  0xf1   :  { %v571_v48 = vadd.f32 %v570_v55, %v499_v13 }
  0xf2   :  { %v644_v54 = vpop.f32.mrf.mxu0 }
  0xf4   :  { %v646_v56 = vpop.f32.mrf.mxu0 }
  0xf8   :  { %v748_v57 = vpop.f32.mrf.mxu1 }
  0xf9   :  { %v749_v16 = vadd.f32 %v748_v57, %v644_v54 }
  0xfa   :  { %v750_v58 = vpop.f32.mrf.mxu1 }
  0xfb   :  { %v829_v4 = vpop.f32.mrf.mxu0  ;;  %v751_v5 = vadd.f32 %v750_v58, %v646_v56 }
  0xfc   :  { %v830_v62 = vadd.f32 %v829_v4, %v749_v16 }
  0xfd   :  { %v831_v60 = vpop.f32.mrf.mxu0 }
  0xfe   :  { %v832_v3 = vadd.f32 %v831_v60, %v751_v5 }
 0x102   :  { %v903_v59 = vpop.f32.mrf.mxu1 }
 0x103   :  { %v904_v6 = vadd.f32 %v903_v59, %v830_v62 }
 0x104   :  { %v905_v0 = vpop.f32.mrf.mxu1 }
 0x105   :  { %v991_v1 = vpop.f32.mrf.mxu0  ;;  %v906_v20 = vadd.f32 %v905_v0, %v832_v3 }
 0x106   :  { %v992_v25 = vadd.f32 %v991_v1, %v904_v6 }
 0x107   :  { %v993_v23 = vpop.f32.mrf.mxu0 }
 0x108   :  { %v994_v32 = vadd.f32 %v993_v23, %v906_v20 }
 0x10c   :  { %v1063_v30 = vpop.f32.mrf.mxu1 }
 0x10d   :  { %v1064_v33 = vadd.f32 %v1063_v30, %v992_v25 }
 0x10e   :  { %v1065_v37 = vpop.f32.mrf.mxu1 }
 0x10f   :  { %v1086_v40 = vmul.f32 %v1079_v27, %v1064_v33  ;;  %v1112_v41 = vmul.f32 %v1105_v28, %v1064_v33  ;;  %v1066_v43 = vadd.f32 %v1065_v37, %v994_v32 }
 0x111   :  { %v1125_v45 = vadd.f32 %v1118_v31, %v1112_v41  ;;  %v1087_v46 = vmul.f32 %v1083_v34, %v1066_v43  ;;  %v1113_v47 = vmul.f32 %v1109_v35, %v1066_v43  ;;  %v1099_v49 = vadd.f32 %v1092_v36, %v1086_v40 }
 0x113   :  { %v1126_v2 = vadd.f32 %v1122_v38, %v1113_v47  ;;  %v1127_v7 = vmul.f32 %v1125_v45, %v569_v14  ;;  %v1100_v9 = vadd.f32 %v1096_v44, %v1087_v46 }
 0x115   :  { %v1128_v10 = vmul.f32 %v1126_v2, %v571_v48  ;;  %v1129_v12 = vadd.f32 %v1127_v7, %v1099_v49 }
 0x117   :  { %v1130_v15 = vadd.f32 %v1128_v10, %v1100_v9  ;;  %1131 = vst [vmem:[#allocation2] sm:$0xff] %v1129_v12 }
 0x119   :  { %1132 = vst [vmem:[#allocation2 + $0x8] sm:$0xff] %v1130_v15 }
 0x11a   :  { %1212 = shalt.err (!%p1209_p4)
}
 0x11b   :  { %1142 = dma.vmem_to_hbm [thread:$0]  %s1140_s26, 256, %s1763_s4, [#allocation3]  }
 0x11c   :  { %1221 = dma.done.wait [#allocation3], 256  }
 0x11d   :  { %1222 = vsyncadd [#allocation3], 4294967040 }
 0x11e   :  { %1146 = vsyncpa [#allocation3], 1 }

</bundles_post_ra>
